<compile_context>
chip_gen: v6e
topology: v6e:2x2x1
jax: 0.10.0
libtpu: 0.0.40
codegen_flags: <defaults>
</compile_context>

<pallas_src>
import functools

import jax
import jax.numpy as jnp
from jax.experimental import pallas as pl
from jax.experimental.pallas import tpu as pltpu


def _moth_kernel(x_ref, if_ref, o_ref, *, bypass: bool):
    x = x_ref[...]                                     # (TB, F)
    F = x.shape[-1]

    # torch.roll(x, shifts=-1, dims=-1): out[..., i] = x[..., (i + 1) % F]
    # jnp.roll semantics with shift = F - 1  ==  shift = -1; pltpu.roll lowers
    # to an XLU lane rotate (correct because each block covers the full F).
    y = pltpu.roll(x, shift=F - 1, axis=1)

    inter_fac = (if_ref[...] + 0.5) * 0.2              # (1, F) -> broadcasts over rows
    a = jax.nn.sigmoid(x)

    w = x - y
    s = jax.nn.sigmoid(w)
    b = w * (2.0 * s - 1.0)                            # == w*s - w*(1-s)

    result = a + inter_fac * (b - a)                   # == a*(1-if) + b*if
    if bypass:
        result = result + x
    o_ref[...] = result


def _choose_row_tile(B, F, itemsize, *, max_tile=2048, vmem_budget=24 * 1024 * 1024):
    """Largest divisor of B that keeps double-buffered (x + out) under budget."""
    # double-buffered input + double-buffered output: ~4 * tb * F * itemsize bytes
    per_row = 4 * F * itemsize
    cap = max(1, vmem_budget // per_row)               # VMEM budget (v7x-safe)
    cap = int(min(cap, max_tile, B))                   # keep grid length > 1 for megacore
    for tb in range(cap, 0, -1):
        if B % tb == 0:
            return tb
    return 1


def moth_layer(x, interpolation_factor, *, bypass: bool = False, row_tile: int | None = None):
    """x: (B, F); interpolation_factor: (1, F)."""
    B, F = x.shape
    assert interpolation_factor.shape == (1, F)

    if row_tile is None:
        tb = _choose_row_tile(B, F, x.dtype.itemsize)
    else:
        tb = min(row_tile, B)
        assert B % tb == 0, "row_tile must divide batch"

    kernel = functools.partial(_moth_kernel, bypass=bypass)
    return pl.pallas_call(
        kernel,
        out_shape=jax.ShapeDtypeStruct((B, F), x.dtype),
        grid_spec=pl.GridSpec(
            grid=(B // tb,),
            in_specs=[
                pl.BlockSpec((tb, F), lambda i: (i, 0)),
                pl.BlockSpec((1, F), lambda i: (0, 0)),   # resident: constant block index
            ],
            out_specs=pl.BlockSpec((tb, F), lambda i: (i, 0)),
        ),
        compiler_params=pltpu.CompilerParams(
            dimension_semantics=("parallel",),            # megacore sharding on v7x
        ),
    )(x, interpolation_factor)


def _moth_reference(x, interpolation_factor, bypass=False):
    y = jnp.roll(x, shift=-1, axis=-1)
    inter_fac = (interpolation_factor + 0.5) * 0.2
    a = jax.nn.sigmoid(x)
    w = x - y
    s = jax.nn.sigmoid(w)
    b = w * s - w * (1.0 - s)
    result = a * (1.0 - inter_fac) + b * inter_fac
    if bypass:
        return result + x
    return result


if __name__ == "__main__":
    key = jax.random.PRNGKey(0)
    k_x, k_p = jax.random.split(key)

    batch, num_features = 16, 128
    x = jax.random.normal(k_x, (batch, num_features), dtype=jnp.float32)
    # nn.Parameter(torch.normal(0, 0.2, size=(1, num_features)))
    interpolation_factor = 0.2 * jax.random.normal(
        k_p, (1, num_features), dtype=jnp.float32
    )

    out = jax.block_until_ready(moth_layer(x, interpolation_factor, bypass=False))
    ref = _moth_reference(x, interpolation_factor, bypass=False)
    assert out.shape == ref.shape and out.dtype == ref.dtype
    assert jnp.allclose(out, ref, atol=1e-5, rtol=1e-5), "mismatch vs reference"

    # also exercise the bypass path once
    out_bp = jax.block_until_ready(moth_layer(x, interpolation_factor, bypass=True))
    ref_bp = _moth_reference(x, interpolation_factor, bypass=True)
    assert jnp.allclose(out_bp, ref_bp, atol=1e-5, rtol=1e-5), "bypass mismatch"

    print("KERNEL_OK")
</pallas_src>

<mosaic_0001>
module attributes {stable_mosaic.version = 11 : i64} {
  func.func @_moth_kernel(%arg0: i32, %arg1: memref<16x128xf32, #tpu.memory_space<vmem>>, %arg2: memref<1x128xf32, #tpu.memory_space<vmem>>, %arg3: memref<16x128xf32, #tpu.memory_space<vmem>>) attributes {dimension_semantics = [#tpu.dimension_semantics<parallel>], iteration_bounds = array<i64: 1>, scalar_prefetch = 0 : i64, scratch_operands = 0 : i64, tpu.core_type = #tpu.core_type<tc>, window_params = [{transform_indices = @transform_0, window_bounds = array<i64: 16, 128>}, {pipeline_mode = #tpu.pipeline_mode<synchronous>, transform_indices = @transform_1, window_bounds = array<i64: 1, 128>}, {transform_indices = @transform_2, window_bounds = array<i64: 16, 128>}]} {
    %c0 = arith.constant 0 : index
    %c0_0 = arith.constant 0 : index
    %0 = vector.load %arg1[%c0, %c0_0] : memref<16x128xf32, #tpu.memory_space<vmem>>, vector<16x128xf32>
    %c127_i32 = arith.constant 127 : i32
    %1 = tpu.dynamic_rotate %0 by %c127_i32 dim 1 : vector<16x128xf32>, i32 -> vector<16x128xf32>
    %c0_1 = arith.constant 0 : index
    %c0_2 = arith.constant 0 : index
    %2 = vector.load %arg2[%c0_1, %c0_2] : memref<1x128xf32, #tpu.memory_space<vmem>>, vector<1x128xf32>
    %cst = arith.constant 5.000000e-01 : f32
    %3 = vector.broadcast %cst : f32 to vector<1x128xf32>
    %4 = arith.addf %2, %3 : vector<1x128xf32>
    %cst_3 = arith.constant 2.000000e-01 : f32
    %5 = vector.broadcast %cst_3 : f32 to vector<1x128xf32>
    %6 = arith.mulf %4, %5 : vector<1x128xf32>
    %7 = arith.negf %0 : vector<16x128xf32>
    %8 = math.exp %7 : vector<16x128xf32>
    %cst_4 = arith.constant 1.000000e+00 : f32
    %9 = vector.broadcast %cst_4 : f32 to vector<16x128xf32>
    %10 = arith.addf %9, %8 : vector<16x128xf32>
    %11 = arith.divf %9, %10 : vector<16x128xf32>
    %12 = arith.subf %0, %1 : vector<16x128xf32>
    %13 = arith.negf %12 : vector<16x128xf32>
    %14 = math.exp %13 : vector<16x128xf32>
    %cst_5 = arith.constant 1.000000e+00 : f32
    %15 = vector.broadcast %cst_5 : f32 to vector<16x128xf32>
    %16 = arith.addf %15, %14 : vector<16x128xf32>
    %17 = arith.divf %15, %16 : vector<16x128xf32>
    %cst_6 = arith.constant 2.000000e+00 : f32
    %18 = vector.broadcast %cst_6 : f32 to vector<16x128xf32>
    %19 = arith.mulf %18, %17 : vector<16x128xf32>
    %cst_7 = arith.constant 1.000000e+00 : f32
    %20 = vector.broadcast %cst_7 : f32 to vector<16x128xf32>
    %21 = arith.subf %19, %20 : vector<16x128xf32>
    %22 = arith.mulf %12, %21 : vector<16x128xf32>
    %23 = arith.subf %22, %11 : vector<16x128xf32>
    %24 = vector.broadcast %6 : vector<1x128xf32> to vector<16x128xf32>
    %25 = arith.mulf %24, %23 : vector<16x128xf32>
    %26 = arith.addf %11, %25 : vector<16x128xf32>
    %c0_8 = arith.constant 0 : index
    %c0_9 = arith.constant 0 : index
    %27 = vector.load %arg3[%c0_8, %c0_9] : memref<16x128xf32, #tpu.memory_space<vmem>>, vector<16x128xf32>
    tpu.vector_store %arg3[%c0_8, %c0_9], %26 {strides = array<i32>} : memref<16x128xf32, #tpu.memory_space<vmem>>, vector<16x128xf32>,
    return
  }
  func.func @transform_0(%arg0: i32) -> (i32, i32) {
    %c0_i32 = arith.constant 0 : i32
    %c0_i32_0 = arith.constant 0 : i32
    return %arg0, %c0_i32 : i32, i32
  }
  func.func @transform_1(%arg0: i32) -> (i32, i32) {
    %c0_i32 = arith.constant 0 : i32
    %c0_i32_0 = arith.constant 0 : i32
    %c0_i32_1 = arith.constant 0 : i32
    return %c0_i32, %c0_i32_0 : i32, i32
  }
  func.func @transform_2(%arg0: i32) -> (i32, i32) {
    %c0_i32 = arith.constant 0 : i32
    %c0_i32_0 = arith.constant 0 : i32
    return %arg0, %c0_i32 : i32, i32
  }
}

</mosaic_0001>

<bundles_post_ra>
// kernel: tpu_custom_call.1
= control target key start
LH: loop header
LB: loop body
LE: loop exit
PB: predicated region body
PF: predicated region fallthrough
CT: control target
= control target key end

     0   :  { %7 = vsyncpa [#allocation3], 0  ;;  %s204_s0 = inlined_call_operand.hbm [shape: f32[16,128], index: 0, kind: input, shape index: {}]   ;;  %s205_s1 = inlined_call_operand.vmem [shape: f32[1,128], index: 1, kind: input, shape index: {}]   ;;  %s206_s2 = inlined_call_operand.hbm [shape: f32[16,128], index: 2, kind: output, shape index: {}]  }
   0x1   :  { %8 = vsyncpa [#allocation4], 0  ;;  %s169_s9 = smov [#allocation2]  }
   0x2   :  { %s14_s10 = sshll.u32 %s169_s9, 4  ;;  %s15_s10 = int_to_ptr.vmem [resolvable:$true] %s14_s10 }
   0x3   :  { %s133_s11 = scalar_lea.vmem %s15_s10, 256  ;;  %p138_p1 = scmp.lt.s32.totalorder %s15_s10, %s15_s10 }
   0x4   :  { %p134_p0 = scmp.ne.s32.totalorder %s15_s10, %s133_s11  ;;  %p139_p2 = scmp.lt.s32.totalorder %s133_s11, %s133_s11 }
   0x6   :  { %p140_p3 = por %p139_p2, %p138_p1 }
   0x8   :  { %p141_p4 = pnand %p140_p3, %p134_p0 }
   0xa   :  { %144 = shalt.err (!%p141_p4)
}
   0xb   :  { %s170_s12 = smov 128   ;;  %s171_s13 = smov 8  }
   0xc   :  { %20 = dma.hbm_to_vmem [thread:$0]  %s204_s0, 256, %s15_s10, [#allocation3], %s170_s12, %s170_s12, %s171_s13  }
   0xd   :  { %165 = dma.done.wait [#allocation3], 256  }
   0xe   :  { %166 = vsyncadd [#allocation3], 4294967040  ;;  %v26_v0 = vld [vmem:[#allocation2] sm:$0xff]  ;;  %s172_s16 = smov 127   ;;  %v27_v1 = vld [vmem:[#allocation2 + $0x8] sm:$0xff]  ;;  %v70_v18 = vlaneseq }
   0xf   :  { %28 = vrot.lane.b32.xlu0 %v26_v0, %s172_s16  ;;  %v98_v2 = vmul.f32 -1.442695, %v26_v0  ;;  %v99_v6 = vmul.f32 -1.442695, %v27_v1  ;;  %v32_v19 = vld [vmem:[%s205_s1] sm:$0x1] }
  0x10   :  { %v33_v20 = vadd.f32 0.5, %v32_v19  ;;  %v71_v21 = vshrl.u32 %v70_v18, 7  ;;  %s173_s1 = smov [#allocation5]  }
  0x11   :  { %109 = vpow2.f32 %v98_v2  ;;  %s86_s18 = sshll.u32 %s173_s1, 4  ;;  %s87_s18 = int_to_ptr.vmem [resolvable:$true] %s86_s18 }
  0x12   :  { %v34_v23 = vmul.f32 0.2, %v33_v20  ;;  %v72_v24 = vsub.s32 0, %v71_v21  ;;  %s145_s19 = scalar_lea.vmem %s87_s18, 256  ;;  %p150_p6 = scmp.lt.s32.totalorder %s87_s18, %s87_s18 }
  0x13   :  { %30 = vrot.lane.b32.xlu0 %v27_v1, %s172_s16  ;;  %p146_p5 = scmp.ne.s32.totalorder %s87_s18, %s145_s19  ;;  %p151_p7 = scmp.lt.s32.totalorder %s145_s19, %s145_s19 }
  0x14   :  { %v73_v29 = vrot.slane %v34_v23, %v72_v24 }
  0x15   :  { %p152_p8 = por %p151_p7, %p150_p6 }
  0x17   :  { %p153_p9 = pnand %p152_p8, %p146_p5 }
  0x1e   :  { %v110_v10 = vpop.eup %109 }
  0x1f   :  { %v41_v13 = vadd.f32 1.0, %v110_v10 }
  0x81   :  { %v29_v3 = vpop.permute.xlu0 %28 }
  0x82   :  { %v47_v4 = vsub.f32 %v26_v0, %v29_v3 }
  0x84   :  { %v100_v5 = vmul.f32 -1.442695, %v47_v4 }
  0x85   :  { %v31_v7 = vpop.permute.xlu0 %30 }
  0x86   :  { %111 = vpow2.f32 %v100_v5  ;;  %v48_v8 = vsub.f32 %v27_v1, %v31_v7 }
  0x87   :  { %113 = vpow2.f32 %v99_v6 }
  0x88   :  { %v101_v9 = vmul.f32 -1.442695, %v48_v8 }
  0x8a   :  { %115 = vpow2.f32 %v101_v9 }
  0x93   :  { %v112_v11 = vpop.eup %111 }
  0x94   :  { %v55_v12 = vadd.f32 1.0, %v112_v11  ;;  %v114_v14 = vpop.eup %113 }
  0x95   :  { %v42_v17 = vadd.f32 1.0, %v114_v14 }
  0x96   :  { %117 = vrcp.f32 %v55_v12 }
  0x97   :  { %v116_v15 = vpop.eup %115  ;;  %119 = vrcp.f32 %v41_v13 }
  0x98   :  { %v56_v16 = vadd.f32 1.0, %v116_v15 }
  0x9a   :  { %121 = vrcp.f32 %v56_v16 }
  0x9b   :  { %123 = vrcp.f32 %v42_v17 }
  0xa3   :  { %v118_v22 = vpop.eup %117 }
  0xa4   :  { %v61_v25 = vmul.f32 2.0, %v118_v22  ;;  %v120_v26 = vpop.eup %119 }
  0xa6   :  { %v102_v27 = vadd.f32 -1.0, %v61_v25 }
  0xa7   :  { %v122_v28 = vpop.eup %121 }
  0xa8   :  { %v65_v30 = vmul.f32 %v102_v27, %v47_v4  ;;  %v62_v31 = vmul.f32 2.0, %v122_v28  ;;  %v124_v34 = vpop.eup %123 }
  0xaa   :  { %v67_v32 = vsub.f32 %v65_v30, %v120_v26  ;;  %v103_v33 = vadd.f32 -1.0, %v62_v31 }
  0xac   :  { %v75_v35 = vmul.f32 %v73_v29, %v67_v32  ;;  %v66_v36 = vmul.f32 %v103_v33, %v48_v8 }
  0xae   :  { %v68_v37 = vsub.f32 %v66_v36, %v124_v34  ;;  %v77_v38 = vadd.f32 %v120_v26, %v75_v35 }
  0xb0   :  { %v76_v39 = vmul.f32 %v73_v29, %v68_v37  ;;  %79 = vst [vmem:[#allocation5] sm:$0xff] %v77_v38 }
  0xb2   :  { %v78_v40 = vadd.f32 %v124_v34, %v76_v39 }
  0xb4   :  { %80 = vst [vmem:[#allocation5 + $0x8] sm:$0xff] %v78_v40 }
  0xb5   :  { %156 = shalt.err (!%p153_p9)
}
  0xb6   :  { %92 = dma.vmem_to_hbm [thread:$0]  %s87_s18, 256, %s206_s2, [#allocation4], %s170_s12, %s170_s12, %s171_s13  }
  0xb7   :  { %167 = dma.done.wait [#allocation4], 256  }
  0xb8   :  { %168 = vsyncadd [#allocation4], 4294967040 }
  0xb9   :  { %96 = vsyncpa [#allocation3], 1 }
  0xba   :  { %97 = vsyncpa [#allocation4], 1 }

</bundles_post_ra>
